<compile_context>
chip_gen: v7x
topology: tpu7x:2x2x1
jax: 0.10.0
libtpu: 0.0.40
codegen_flags: <defaults>
</compile_context>

<pallas_src>
import functools
import math

import jax
import jax.numpy as jnp
from jax import lax
from jax.experimental import pallas as pl
from jax.experimental.pallas import tpu as pltpu

NTXENT_TEMP = 0.5   # options.ntxent_temp (deterministic in-script "config")
NTXENT_EPS = 1e-8


def _round_up(a, b):
    return ((a + b - 1) // b) * b


def _tpu_defaults():
    """Generation-aware (row-tile, scoped-VMEM-budget) defaults."""
    try:
        vmem_cap = int(pltpu.get_tpu_info().vmem_capacity_bytes)
    except Exception:
        vmem_cap = 64 << 20                      # conservative fallback
    if vmem_cap <= (96 << 20):                   # v7x-class: 64 MiB / TC
        return 128, 48 << 20                     # tm, vmem budget (headroom kept)
    return 256, 100 << 20                        # v5e / v6e: 128 MiB physical


def _prep_kernel(x_ref, y_ref, zn_ref, t1_ref, *, num_data, feat_dim, d_pad,
                 tile_rows, inv_sqrt_temp, eps):
    """Per-row-tile: normalize, fold temperature, term1 partial, padded slab tile.

    x_ref, y_ref : [tm, D] raw feature tiles (pipelined)
    zn_ref       : [2, tm, d_pad] slab tile (axis 0: x-half / y-half)
    t1_ref       : [1, 1, 128] lane-padded term1 partial (same value in all lanes)
    """
    i = pl.program_id(0)
    row_ids = i * tile_rows + lax.broadcasted_iota(jnp.int32, (tile_rows, 1), 0)
    valid = row_ids < num_data                      # mask garbage edge rows

    x = x_ref[...].astype(jnp.float32)
    y = y_ref[...].astype(jnp.float32)

    def _unit(v):
        # F.normalize: v / max(||v||_2, eps) == v * min(rsqrt(sum v^2), 1/eps)
        sumsq = jnp.sum(v * v, axis=1, keepdims=True)
        scale = jnp.minimum(lax.rsqrt(sumsq), 1.0 / eps)   # EUP rsqrt, no divide
        return v * scale

    # Fold temperature into the operands: z_i . z_j / temp == zx_i . zy_j .
    zx = jnp.where(valid, _unit(x) * inv_sqrt_temp, 0.0)
    zy = jnp.where(valid, _unit(y) * inv_sqrt_temp, 0.0)

    # Positive pairs: term1 = 2 * sum_i log(exp(zx_i . zy_i) + eps)  (f32, O(N*D))
    pos_z = jnp.sum(zx * zy, axis=1, keepdims=True)
    t1 = jnp.where(valid, jnp.log(jnp.exp(pos_z) + eps), 0.0)
    t1_ref[...] = jnp.broadcast_to(2.0 * jnp.sum(t1), t1_ref.shape)

    # Write live feature columns; zero only the pad columns (no full zero-fill pass).
    zn_ref[0, :, 0:feat_dim] = zx.astype(zn_ref.dtype)
    zn_ref[1, :, 0:feat_dim] = zy.astype(zn_ref.dtype)
    if feat_dim < d_pad:
        pad = jnp.zeros((tile_rows, d_pad - feat_dim), zn_ref.dtype)
        zn_ref[0, :, feat_dim:d_pad] = pad
        zn_ref[1, :, feat_dim:d_pad] = pad


def _term2_tile_kernel(z_all_ref, out_ref, *, num_data, half_pad, tile_rows,
                       col_chunk, num_chunks, sub_const):
    """Per-row-tile partial of term2 with column chunking.

    z_all_ref : [rows_pad, d_pad] resident slab (single VMEM copy; LHS sliced from it)
    out_ref   : [1, 1, 128] lane-padded partial sum
    """
    i = pl.program_id(0)
    row0 = pl.multiple_of(i * tile_rows, tile_rows)
    lhs = z_all_ref[pl.ds(row0, tile_rows), :]          # [tm, d_pad]

    def _chunk_row_sum(col0):
        rhs = z_all_ref[pl.ds(col0, col_chunk), :]      # [cc, d_pad]
        # A @ B^T via dot_general on the last dims (flash-attention q.k^T pattern):
        # Mosaic feeds the MXU directly, no materialized transpose.  Temperature
        # already folded into the operands.
        s = lax.dot_general(lhs, rhs, (((1,), (1,)), ((), ())),
                            preferred_element_type=jnp.float32)
        return jnp.sum(jnp.exp(s), axis=1, keepdims=True)

    if num_chunks == 1:
        row_sum = _chunk_row_sum(0)
    else:
        def body(c, acc):
            return acc + _chunk_row_sum(pl.multiple_of(c * col_chunk, col_chunk))
        row_sum = lax.fori_loop(0, num_chunks, body,
                                jnp.zeros((tile_rows, 1), jnp.float32),
                                unroll=(num_chunks <= 8))

    # Live rows: [0, N) in the x half and [half_pad, half_pad + N) in the y half.
    row_ids = i * tile_rows + lax.broadcasted_iota(jnp.int32, (tile_rows, 1), 0)
    valid = (row_ids < num_data) | (
        (row_ids >= half_pad) & (row_ids < half_pad + num_data))
    # sub_const = num_pad_cols * exp(0) + exp(1/temp) - eps  (exact pad correction).
    arg = jnp.where(valid, row_sum - sub_const, 1.0)
    out_ref[...] = jnp.broadcast_to(jnp.sum(jnp.log(arg)), out_ref.shape)


def ntxent_loss(x, y, *, temp=NTXENT_TEMP, eps=NTXENT_EPS,
                mxu_dtype=jnp.bfloat16, tile_rows=None):
    assert x.shape == y.shape, (
        f"Input to loss functions must be of same shape. Got {x.shape} and {y.shape}."
    )
    n, d = x.shape
    rows = 2 * n
    d_pad = _round_up(d, 128)                      # lane-aligned feature dim
    itemsize = jnp.dtype(mxu_dtype).itemsize
    row_align = 8 if itemsize == 4 else (16 if itemsize == 2 else 32)

    tm_default, vmem_budget = _tpu_defaults()
    if tile_rows is None:
        tile_rows = tm_default
    tm = min(tile_rows, _round_up(max(n, row_align), row_align))
    tm = _round_up(tm, row_align)                  # sublane-pack aligned row tile
    n_pad = _round_up(n, tm)                       # per-half padded rows
    num_n_tiles = n_pad // tm
    rows_pad = 2 * n_pad                           # total slab rows
    num_tiles = rows_pad // tm
    inv_sqrt_temp = 1.0 / math.sqrt(temp)

    # Column chunking for term2: largest <=1024 chunk dividing rows_pad.
    if rows_pad <= 1024:
        col_chunk = rows_pad
    else:
        col_chunk = rows_pad
        for c in (1024, 512, 256, 128):
            if rows_pad % c == 0:
                col_chunk = c
                break
    num_chunks = rows_pad // col_chunk

    # ---- kernel 1: gridded prep (normalize + temp fold + term1 partials + slab) ----
    prep_vmem = int(4 * tm * d * 4                       # x,y tiles, double-buffered
                    + 2 * 2 * tm * d_pad * itemsize      # zn out blocks, double-buffered
                    + 4 * tm * d_pad * 4                 # f32 temporaries
                    + (4 << 20))
    prep_limit = int(min(max(prep_vmem, 8 << 20), vmem_budget))

    zn, t1_parts = pl.pallas_call(
        functools.partial(_prep_kernel, num_data=n, feat_dim=d, d_pad=d_pad,
                          tile_rows=tm, inv_sqrt_temp=inv_sqrt_temp, eps=eps),
        out_shape=(jax.ShapeDtypeStruct((2, n_pad, d_pad), mxu_dtype),
                   jax.ShapeDtypeStruct((num_n_tiles, 1, 128), jnp.float32)),
        grid=(num_n_tiles,),
        in_specs=[pl.BlockSpec((tm, d), lambda i: (i, 0)),
                  pl.BlockSpec((tm, d), lambda i: (i, 0))],
        out_specs=(pl.BlockSpec((2, tm, d_pad), lambda i: (0, i, 0)),
                   pl.BlockSpec((1, 1, 128), lambda i: (i, 0, 0))),
        compiler_params=pltpu.CompilerParams(
            dimension_semantics=("parallel",),
            vmem_limit_bytes=prep_limit),
    )(x, y)

    # ---- kernel 2: tiled term2; resident slab read once, LHS sliced in-kernel ----
    # TODO(synk): for 2N so large that the slab alone exceeds the VMEM budget,
    # fall back to a grid-streamed (blocked) RHS instead of a resident copy.
    sub_const = float(rows_pad - rows) + math.exp(1.0 / temp) - eps
    t2_vmem = int(2 * rows_pad * d_pad * itemsize        # resident slab (+ margin)
                  + tm * d_pad * itemsize                # lhs slice copy
                  + 3 * tm * col_chunk * 4               # per-chunk f32 temporaries
                  + (4 << 20))
    t2_limit = int(min(max(t2_vmem, 8 << 20), vmem_budget))

    zn_flat = zn.reshape(rows_pad, d_pad)                # contiguous, no-copy reshape
    t2_parts = pl.pallas_call(
        functools.partial(_term2_tile_kernel, num_data=n, half_pad=n_pad,
                          tile_rows=tm, col_chunk=col_chunk,
                          num_chunks=num_chunks, sub_const=sub_const),
        out_shape=jax.ShapeDtypeStruct((num_tiles, 1, 128), jnp.float32),
        grid=(num_tiles,),
        in_specs=[pl.BlockSpec(memory_space=pltpu.MemorySpace.VMEM)],
        out_specs=pl.BlockSpec((1, 1, 128), lambda i: (i, 0, 0)),
        compiler_params=pltpu.CompilerParams(
            dimension_semantics=("parallel",),
            vmem_limit_bytes=t2_limit),
    )(zn_flat)

    term1 = jnp.sum(t1_parts[:, 0, 0])
    term2 = jnp.sum(t2_parts[:, 0, 0])
    return (-term1 + term2) / rows


def _ntxent_reference(x, y, *, temp=NTXENT_TEMP, eps=NTXENT_EPS):
    # Pure-JAX reference mirroring the PyTorch forward exactly.
    n = x.shape[0]
    s = jnp.concatenate([x, y], axis=0).astype(jnp.float32)
    s = s / jnp.maximum(jnp.linalg.norm(s, axis=1, keepdims=True), eps)
    sim = jnp.exp(s @ s.T / temp)
    term11 = jnp.sum(jnp.log(jnp.diagonal(sim, offset=n) + eps))
    term12 = jnp.sum(jnp.log(jnp.diagonal(sim, offset=-n) + eps))
    term2 = jnp.sum(jnp.log(jnp.sum(sim, axis=1) - math.exp(1.0 / temp) + eps))
    return (-(term11 + term12) + term2) / (2 * n)


if __name__ == "__main__":
    key = jax.random.PRNGKey(0)
    kx, ky = jax.random.split(key)
    N, D = 8, 32  # small shapes: batch of 8 feature vectors of dim 32
    x = jax.random.normal(kx, (N, D), dtype=jnp.float32)
    y = jax.random.normal(ky, (N, D), dtype=jnp.float32)

    ref = jax.block_until_ready(_ntxent_reference(x, y))

    # f32 MXU operands: tight agreement with the pure-JAX reference.
    loss_f32 = jax.block_until_ready(ntxent_loss(x, y, mxu_dtype=jnp.float32))
    assert jnp.isfinite(loss_f32), f"non-finite loss: {loss_f32}"
    assert jnp.allclose(loss_f32, ref, rtol=1e-4, atol=1e-4), f"{loss_f32} vs {ref}"

    # bf16 MXU operands (default, full-rate MXU).  Note: the bf16 self-similarity
    # diagonal deviates slightly from exp(1/temp) while sub_const subtracts the
    # exact constant; this stays within the looser tolerance (f32 path is exact).
    loss_bf16 = jax.block_until_ready(ntxent_loss(x, y))
    assert jnp.isfinite(loss_bf16), f"non-finite loss: {loss_bf16}"
    assert jnp.allclose(loss_bf16, ref, rtol=2e-2, atol=2e-2), f"{loss_bf16} vs {ref}"

    print("KERNEL_OK")
</pallas_src>

<mosaic_0001>
module attributes {stable_mosaic.version = 11 : i64} {
  func.func @_prep_kernel(%arg0: i32, %arg1: memref<8x32xf32, #tpu.memory_space<vmem>>, %arg2: memref<8x32xf32, #tpu.memory_space<vmem>>, %arg3: memref<2x8x128xf32, #tpu.memory_space<vmem>>, %arg4: memref<1x1x128xf32, #tpu.memory_space<vmem>>) attributes {dimension_semantics = [#tpu.dimension_semantics<parallel>], iteration_bounds = array<i64: 1>, scalar_prefetch = 0 : i64, scratch_operands = 0 : i64, tpu.core_type = #tpu.core_type<tc>, window_params = [{transform_indices = @transform_0, window_bounds = array<i64: 8, 32>}, {transform_indices = @transform_1, window_bounds = array<i64: 8, 32>}, {transform_indices = @transform_2, window_bounds = array<i64: 2, 8, 128>}, {transform_indices = @transform_3, window_bounds = array<i64: 1, 1, 128>}]} {
    %c8_i32 = arith.constant 8 : i32
    %0 = arith.muli %arg0, %c8_i32 : i32
    %1 = tpu.iota {dimensions = array<i32: 0>} : vector<8x1xi32>
    %2 = vector.broadcast %0 : i32 to vector<8x1xi32>
    %3 = arith.addi %2, %1 : vector<8x1xi32>
    %c8_i32_0 = arith.constant 8 : i32
    %4 = vector.broadcast %c8_i32_0 : i32 to vector<8x1xi32>
    %5 = arith.cmpi slt, %3, %4 : vector<8x1xi32>
    %c0 = arith.constant 0 : index
    %c0_1 = arith.constant 0 : index
    %6 = vector.load %arg1[%c0, %c0_1] : memref<8x32xf32, #tpu.memory_space<vmem>>, vector<8x32xf32>
    %c0_2 = arith.constant 0 : index
    %c0_3 = arith.constant 0 : index
    %7 = vector.load %arg2[%c0_2, %c0_3] : memref<8x32xf32, #tpu.memory_space<vmem>>, vector<8x32xf32>
    %8 = arith.mulf %6, %6 : vector<8x32xf32>
    %cst = arith.constant dense<0.000000e+00> : vector<8xf32>
    %9 = vector.multi_reduction <add>, %8, %cst [1] : vector<8x32xf32> to vector<8xf32>
    %10 = vector.shape_cast %9 : vector<8xf32> to vector<8x1xf32>
    %11 = math.rsqrt %10 : vector<8x1xf32>
    %cst_4 = arith.constant 1.000000e+08 : f32
    %12 = vector.broadcast %cst_4 : f32 to vector<8x1xf32>
    %13 = arith.minimumf %11, %12 : vector<8x1xf32>
    %14 = vector.broadcast %13 : vector<8x1xf32> to vector<8x32xf32>
    %15 = arith.mulf %6, %14 : vector<8x32xf32>
    %cst_5 = arith.constant 1.41421354 : f32
    %16 = vector.broadcast %cst_5 : f32 to vector<8x32xf32>
    %17 = arith.mulf %15, %16 : vector<8x32xf32>
    %cst_6 = arith.constant 0.000000e+00 : f32
    %18 = vector.shape_cast %5 : vector<8x1xi1> to vector<8x1xi1>
    %19 = vector.broadcast %18 : vector<8x1xi1> to vector<8x32xi1>
    %20 = vector.broadcast %cst_6 : f32 to vector<8x32xf32>
    %21 = arith.select %19, %17, %20 : vector<8x32xi1>, vector<8x32xf32>
    %22 = arith.mulf %7, %7 : vector<8x32xf32>
    %cst_7 = arith.constant dense<0.000000e+00> : vector<8xf32>
    %23 = vector.multi_reduction <add>, %22, %cst_7 [1] : vector<8x32xf32> to vector<8xf32>
    %24 = vector.shape_cast %23 : vector<8xf32> to vector<8x1xf32>
    %25 = math.rsqrt %24 : vector<8x1xf32>
    %cst_8 = arith.constant 1.000000e+08 : f32
    %26 = vector.broadcast %cst_8 : f32 to vector<8x1xf32>
    %27 = arith.minimumf %25, %26 : vector<8x1xf32>
    %28 = vector.broadcast %27 : vector<8x1xf32> to vector<8x32xf32>
    %29 = arith.mulf %7, %28 : vector<8x32xf32>
    %cst_9 = arith.constant 1.41421354 : f32
    %30 = vector.broadcast %cst_9 : f32 to vector<8x32xf32>
    %31 = arith.mulf %29, %30 : vector<8x32xf32>
    %cst_10 = arith.constant 0.000000e+00 : f32
    %32 = vector.shape_cast %5 : vector<8x1xi1> to vector<8x1xi1>
    %33 = vector.broadcast %32 : vector<8x1xi1> to vector<8x32xi1>
    %34 = vector.broadcast %cst_10 : f32 to vector<8x32xf32>
    %35 = arith.select %33, %31, %34 : vector<8x32xi1>, vector<8x32xf32>
    %36 = arith.mulf %21, %35 : vector<8x32xf32>
    %cst_11 = arith.constant dense<0.000000e+00> : vector<8xf32>
    %37 = vector.multi_reduction <add>, %36, %cst_11 [1] : vector<8x32xf32> to vector<8xf32>
    %38 = vector.shape_cast %37 : vector<8xf32> to vector<8x1xf32>
    %39 = math.exp %38 : vector<8x1xf32>
    %cst_12 = arith.constant 9.99999993E-9 : f32
    %40 = vector.broadcast %cst_12 : f32 to vector<8x1xf32>
    %41 = arith.addf %39, %40 : vector<8x1xf32>
    %42 = math.log %41 : vector<8x1xf32>
    %cst_13 = arith.constant 0.000000e+00 : f32
    %43 = vector.broadcast %cst_13 : f32 to vector<8x1xf32>
    %44 = arith.select %5, %42, %43 : vector<8x1xi1>, vector<8x1xf32>
    %45 = vector.shape_cast %44 : vector<8x1xf32> to vector<1x8x1xf32>
    %cst_14 = arith.constant dense<0.000000e+00> : vector<1xf32>
    %46 = vector.multi_reduction <add>, %45, %cst_14 [1, 2] : vector<1x8x1xf32> to vector<1xf32>
    %47 = vector.shape_cast %46 : vector<1xf32> to vector<1x1x1xf32>
    %48 = vector.extract %47[0, 0, 0] : f32 from vector<1x1x1xf32>
    %cst_15 = arith.constant 2.000000e+00 : f32
    %49 = arith.mulf %cst_15, %48 : f32
    %50 = vector.broadcast %49 : f32 to vector<1x1x128xf32>
    %c0_16 = arith.constant 0 : index
    %c0_17 = arith.constant 0 : index
    %c0_18 = arith.constant 0 : index
    %51 = vector.load %arg4[%c0_16, %c0_17, %c0_18] : memref<1x1x128xf32, #tpu.memory_space<vmem>>, vector<1x1x128xf32>
    tpu.vector_store %arg4[%c0_16, %c0_17, %c0_18], %50 {strides = array<i32>} : memref<1x1x128xf32, #tpu.memory_space<vmem>>, vector<1x1x128xf32>,
    %c0_19 = arith.constant 0 : index
    %c0_20 = arith.constant 0 : index
    %c0_21 = arith.constant 0 : index
    %52 = vector.load %arg3[%c0_19, %c0_20, %c0_21] : memref<2x8x128xf32, #tpu.memory_space<vmem>>, vector<1x8x32xf32>
    %53 = vector.shape_cast %52 : vector<1x8x32xf32> to vector<8x32xf32>
    %54 = vector.shape_cast %21 : vector<8x32xf32> to vector<1x8x32xf32>
    tpu.vector_store %arg3[%c0_19, %c0_20, %c0_21], %54 {strides = array<i32>} : memref<2x8x128xf32, #tpu.memory_space<vmem>>, vector<1x8x32xf32>,
    %c1 = arith.constant 1 : index
    %c0_22 = arith.constant 0 : index
    %c0_23 = arith.constant 0 : index
    %55 = vector.load %arg3[%c1, %c0_22, %c0_23] : memref<2x8x128xf32, #tpu.memory_space<vmem>>, vector<1x8x32xf32>
    %56 = vector.shape_cast %55 : vector<1x8x32xf32> to vector<8x32xf32>
    %57 = vector.shape_cast %35 : vector<8x32xf32> to vector<1x8x32xf32>
    tpu.vector_store %arg3[%c1, %c0_22, %c0_23], %57 {strides = array<i32>} : memref<2x8x128xf32, #tpu.memory_space<vmem>>, vector<1x8x32xf32>,
    %cst_24 = arith.constant 0.000000e+00 : f32
    %58 = vector.broadcast %cst_24 : f32 to vector<8x96xf32>
    %c0_25 = arith.constant 0 : index
    %c0_26 = arith.constant 0 : index
    %c32 = arith.constant 32 : index
    %59 = vector.load %arg3[%c0_25, %c0_26, %c32] : memref<2x8x128xf32, #tpu.memory_space<vmem>>, vector<1x8x96xf32>
    %60 = vector.shape_cast %59 : vector<1x8x96xf32> to vector<8x96xf32>
    %61 = vector.shape_cast %58 : vector<8x96xf32> to vector<1x8x96xf32>
    tpu.vector_store %arg3[%c0_25, %c0_26, %c32], %61 {strides = array<i32>} : memref<2x8x128xf32, #tpu.memory_space<vmem>>, vector<1x8x96xf32>,
    %c1_27 = arith.constant 1 : index
    %c0_28 = arith.constant 0 : index
    %c32_29 = arith.constant 32 : index
    %62 = vector.load %arg3[%c1_27, %c0_28, %c32_29] : memref<2x8x128xf32, #tpu.memory_space<vmem>>, vector<1x8x96xf32>
    %63 = vector.shape_cast %62 : vector<1x8x96xf32> to vector<8x96xf32>
    %64 = vector.shape_cast %58 : vector<8x96xf32> to vector<1x8x96xf32>
    tpu.vector_store %arg3[%c1_27, %c0_28, %c32_29], %64 {strides = array<i32>} : memref<2x8x128xf32, #tpu.memory_space<vmem>>, vector<1x8x96xf32>,
    return
  }
  func.func @transform_0(%arg0: i32) -> (i32, i32) {
    %c0_i32 = arith.constant 0 : i32
    %c0_i32_0 = arith.constant 0 : i32
    return %arg0, %c0_i32 : i32, i32
  }
  func.func @transform_1(%arg0: i32) -> (i32, i32) {
    %c0_i32 = arith.constant 0 : i32
    %c0_i32_0 = arith.constant 0 : i32
    return %arg0, %c0_i32 : i32, i32
  }
  func.func @transform_2(%arg0: i32) -> (i32, i32, i32) {
    %c0_i32 = arith.constant 0 : i32
    %c0_i32_0 = arith.constant 0 : i32
    %c0_i32_1 = arith.constant 0 : i32
    return %c0_i32, %arg0, %c0_i32_0 : i32, i32, i32
  }
  func.func @transform_3(%arg0: i32) -> (i32, i32, i32) {
    %c0_i32 = arith.constant 0 : i32
    %c0_i32_0 = arith.constant 0 : i32
    %c0_i32_1 = arith.constant 0 : i32
    return %arg0, %c0_i32, %c0_i32_0 : i32, i32, i32
  }
}

</mosaic_0001>

<bundles_post_ra>
// kernel: tpu_custom_call.1
= control target key start
LH: loop header
LB: loop body
LE: loop exit
PB: predicated region body
PF: predicated region fallthrough
CT: control target
= control target key end

     0   :  { %9 = vsyncpa [#allocation3], 0  ;;  %s323_s0 = inlined_call_operand.hbm [shape: f32[8,32], index: 0, kind: input, shape index: {}]   ;;  %s324_s1 = inlined_call_operand.hbm [shape: f32[8,32], index: 1, kind: input, shape index: {}]   ;;  %s325_s2 = inlined_call_operand.hbm [shape: f32[2,8,128], index: 2, kind: output, shape index: {0}]   ;;  %s326_s3 = inlined_call_operand.hbm [shape: f32[1,1,128], index: 3, kind: output, shape index: {1}]  }
   0x1   :  { %10 = vsyncpa [#allocation6], 0 }
   0x2   :  { %11 = vsyncpa [#allocation4], 0 }
   0x3   :  { %12 = vsyncpa [#allocation9], 0  ;;  %s243_s12 = smov [#allocation2]   ;;  %s244_s14 = smov [#allocation5]  }
   0x4   :  { %s19_s13 = sshll.u32 %s243_s12, 4  ;;  %s29_s15 = sshll.u32 %s244_s14, 4  ;;  %s20_s13 = int_to_ptr.vmem [resolvable:$true] %s19_s13  ;;  %s30_s15 = int_to_ptr.vmem [resolvable:$true] %s29_s15 }
   0x5   :  { %s147_s18 = scalar_lea.hbm %s323_s0, 128 }
   0x6   :  { %p148_p0 = scmp.ne.s32.totalorder %s323_s0, %s147_s18  ;;  %p151_p1 = scmp.lt.u32.totalorder %s147_s18, %s323_s0 }
   0x8   :  { %p153_p2 = pnand %p151_p1, %p148_p0 }
   0xa   :  { %156 = shalt.err (!%p153_p2)
}
   0xb   :  { %s157_s23 = scalar_lea.vmem %s20_s13, 128  ;;  %p162_p4 = scmp.lt.s32.totalorder %s20_s13, %s20_s13 }
   0xc   :  { %p158_p3 = scmp.ne.s32.totalorder %s20_s13, %s157_s23  ;;  %p163_p5 = scmp.lt.s32.totalorder %s157_s23, %s157_s23 }
   0xe   :  { %p164_p6 = por %p163_p5, %p162_p4 }
  0x10   :  { %p165_p7 = pnand %p164_p6, %p158_p3 }
  0x12   :  { %168 = shalt.err (!%p165_p7)
}
  0x13   :  { %22 = dma.hbm_to_vmem [thread:$0]  %s323_s0, 128, %s20_s13, [#allocation3]  }
  0x14   :  { %s169_s28 = scalar_lea.hbm %s324_s1, 128 }
  0x15   :  { %p170_p8 = scmp.ne.s32.totalorder %s324_s1, %s169_s28  ;;  %p173_p9 = scmp.lt.u32.totalorder %s169_s28, %s324_s1 }
  0x17   :  { %p175_p10 = pnand %p173_p9, %p170_p8 }
  0x19   :  { %178 = shalt.err (!%p175_p10)
}
  0x1a   :  { %s179_s6 = scalar_lea.vmem %s30_s15, 128  ;;  %p184_p12 = scmp.lt.s32.totalorder %s30_s15, %s30_s15 }
  0x1b   :  { %p180_p11 = scmp.ne.s32.totalorder %s30_s15, %s179_s6  ;;  %p185_p13 = scmp.lt.s32.totalorder %s179_s6, %s179_s6 }
  0x1d   :  { %p186_p0 = por %p185_p13, %p184_p12 }
  0x1f   :  { %p187_p1 = pnand %p186_p0, %p180_p11 }
  0x21   :  { %190 = shalt.err (!%p187_p1)
}
  0x22   :  { %32 = dma.hbm_to_vmem [thread:$0]  %s324_s1, 128, %s30_s15, [#allocation6]  }
  0x23   :  { %235 = dma.done.wait [#allocation3], 128  }
  0x24   :  { %236 = vsyncadd [#allocation3], 4294967168 }
  0x25   :  { %237 = dma.done.wait [#allocation6], 128  }
  0x26   :  { %238 = vsyncadd [#allocation6], 4294967168  ;;  %v45_v0 = vld [vmem:[#allocation2] sm:$0xff]  ;;  %vm48_vm0 = vcmask 261120   ;;  %v46_v1 = vld [vmem:[#allocation5] sm:$0xff]  ;;  %vm78_vm1 = vcmask 7168  }
  0x27   :  { %v47_v2 = vmul.f32 %v45_v0, %v45_v0  ;;  %v59_v3 = vmul.f32 %v46_v1, %v46_v1  ;;  %vm95_vm2 = vcmask 1047808   ;;  %s245_s1 = smov [#allocation7]   ;;  %v246_v25 = vmov 0.0  }
  0x28   :  { %s103_s8 = sshll.u32 %s245_s1, 4  ;;  %s104_s8 = int_to_ptr.vmem [resolvable:$true] %s103_s8 }
  0x29   :  { %v49_v4 = vsel %vm48_vm0, %v47_v2, 0.0  ;;  %v60_v5 = vsel %vm48_vm0, %v59_v3, 0.0  ;;  %s191_s9 = scalar_lea.vmem %s104_s8, 256  ;;  %p196_p3 = scmp.lt.s32.totalorder %s104_s8, %s104_s8 }
  0x2a   :  { %50 = vadd.xlane.f32.xlu0 %v49_v4  ;;  %p192_p2 = scmp.ne.s32.totalorder %s104_s8, %s191_s9  ;;  %p197_p4 = scmp.lt.s32.totalorder %s191_s9, %s191_s9 }
  0x2c   :  { %p198_p5 = por %p197_p4, %p196_p3 }
  0x2e   :  { %61 = vadd.xlane.f32.xlu0 %v60_v5  ;;  %p199_p6 = pnand %p198_p5, %p192_p2 }
  0xb7   :  { %v51_v6 = vpop.xlane.xlu0 %50 }
  0xb8   :  { %139 = vrsqrt.f32 %v51_v6 }
  0xbb   :  { %v62_v7 = vpop.xlane.xlu0 %61 }
  0xbc   :  { %141 = vrsqrt.f32 %v62_v7 }
  0xc2   :  { %v140_v8 = vpop.eup %139 }
  0xc3   :  { %v53_v9 = vmin.f32 %v140_v8, 1e+08 }
  0xc5   :  { %v54_v10 = vmul.f32 %v53_v9, %v45_v0 }
  0xc6   :  { %v142_v11 = vpop.eup %141 }
  0xc7   :  { %v64_v12 = vmin.f32 %v142_v11, 1e+08  ;;  %v55_v13 = vmul.f32 1.4142135, %v54_v10 }
  0xc9   :  { %v65_v14 = vmul.f32 %v64_v12, %v46_v1  ;;  %92 = vst.msk [vmem:[#allocation7] sm:$0xff] %vm48_vm0, %v55_v13 }
  0xca   :  { %96 = vst.msk [vmem:[#allocation7] sm:$0xff] %vm95_vm2, %v246_v25 }
  0xcb   :  { %v66_v15 = vmul.f32 1.4142135, %v65_v14 }
  0xcd   :  { %v68_v16 = vmul.f32 %v66_v15, %v55_v13  ;;  %94 = vst.msk [vmem:[#allocation7 + $0x8] sm:$0xff] %vm48_vm0, %v66_v15 }
  0xce   :  { %97 = vst.msk [vmem:[#allocation7 + $0x8] sm:$0xff] %vm95_vm2, %v246_v25 }
  0xcf   :  { %v69_v17 = vsel %vm48_vm0, %v68_v16, 0.0 }
  0xd0   :  { %70 = vadd.xlane.f32.xlu1 %v69_v17 }
 0x15d   :  { %v71_v18 = vpop.xlane.xlu1 %70 }
 0x15e   :  { %v72_v19 = vmul.f32 1.442695, %v71_v18 }
 0x160   :  { %143 = vpow2.f32 %v72_v19 }
 0x16a   :  { %v144_v20 = vpop.eup %143 }
 0x16b   :  { %v74_v21 = vadd.f32 1e-08, %v144_v20 }
 0x16d   :  { %145 = vlog2.f32 %v74_v21 }
 0x177   :  { %v146_v22 = vpop.eup %145 }
 0x178   :  { %v76_v23 = vmul.f32 0.6931472, %v146_v22 }
 0x17a   :  { %v79_v24 = vsel %vm78_vm1, %v76_v23, 0.0 }
 0x17b   :  { %80 = vadd.xlane.f32.xlu1 %v79_v24 }
 0x17c   :  { %202 = shalt.err (!%p199_p6)
}
 0x17d   :  { %s203_s12 = scalar_lea.hbm %s325_s2, 256 }
 0x17e   :  { %p204_p7 = scmp.ne.s32.totalorder %s325_s2, %s203_s12  ;;  %p207_p8 = scmp.lt.u32.totalorder %s203_s12, %s325_s2 }
 0x180   :  { %p209_p9 = pnand %p207_p8, %p204_p7 }
 0x182   :  { %212 = shalt.err (!%p209_p9)
}
 0x183   :  { %s247_s17 = smov 128   ;;  %s248_s18 = smov 8  }
 0x184   :  { %109 = dma.vmem_to_hbm [thread:$0]  %s104_s8, 256, %s325_s2, [#allocation4], %s247_s17, %s247_s17, %s248_s18  }
 0x185   :  { %s249_s21 = smov [#allocation8]  }
 0x186   :  { %s116_s22 = sshll.u32 %s249_s21, 4  ;;  %s117_s22 = int_to_ptr.vmem [resolvable:$true] %s116_s22 }
 0x187   :  { %s213_s25 = scalar_lea.vmem %s117_s22, 16  ;;  %s217_s26 = scalar_lea.vmem %s117_s22, 32 }
 0x188   :  { %p214_p10 = scmp.ne.s32.totalorder %s117_s22, %s213_s25  ;;  %p218_p11 = scmp.lt.s32.totalorder %s117_s22, %s117_s22 }
 0x189   :  { %p219_p12 = scmp.lt.s32.totalorder %s217_s26, %s213_s25 }
 0x18b   :  { %p220_p13 = por %p219_p12, %p218_p11 }
 0x18d   :  { %p221_p0 = pnand %p220_p13, %p214_p10 }
 0x208   :  { %v81_v26 = vpop.xlane.xlu1 %80 }
 0x209   :  { %v82_v27 = vrot.slane %v81_v26, 4 }
 0x20b   :  { %v83_v28 = vadd.f32 %v82_v27, %v81_v26 }
 0x20d   :  { %v84_v29 = vrot.slane %v83_v28, 2 }
 0x20f   :  { %v85_v30 = vadd.f32 %v84_v29, %v83_v28 }
 0x211   :  { %v86_v31 = vrot.slane %v85_v30, 1 }
 0x213   :  { %v87_v32 = vadd.f32 %v86_v31, %v85_v30 }
 0x215   :  { %130 = vpush %v87_v32 }
 0x246   :  { %s131_s23 = spop %130 }
 0x247   :  { %s89_s24 = smul.f32 2.0, %s131_s23 }
 0x249   :  { %v90_v33 = vstv %s89_s24 }
 0x24a   :  { %91 = vst [vmem:[#allocation8] sm:$0x1] %v90_v33 }
 0x24b   :  { %224 = shalt.err (!%p221_p0)
}
 0x24c   :  { %s225_s28 = scalar_lea.hbm %s326_s3, 16 }
 0x24d   :  { %p226_p1 = scmp.ne.s32.totalorder %s326_s3, %s225_s28  ;;  %p229_p2 = scmp.lt.u32.totalorder %s225_s28, %s326_s3 }
 0x24f   :  { %p231_p3 = pnand %p229_p2, %p226_p1 }
 0x251   :  { %234 = shalt.err (!%p231_p3)
}
 0x252   :  { %119 = dma.vmem_to_hbm [thread:$0]  %s117_s22, 16, %s326_s3, [#allocation9]  }
 0x253   :  { %239 = dma.done.wait [#allocation4], 256  }
 0x254   :  { %240 = vsyncadd [#allocation4], 4294967040 }
 0x255   :  { %241 = dma.done.wait [#allocation9], 16  }
 0x256   :  { %242 = vsyncadd [#allocation9], 4294967280 }
 0x257   :  { %126 = vsyncpa [#allocation3], 1 }
 0x258   :  { %127 = vsyncpa [#allocation6], 1 }
 0x259   :  { %128 = vsyncpa [#allocation4], 1 }
 0x25a   :  { %129 = vsyncpa [#allocation9], 1 }

</bundles_post_ra>
